<compile_context>
chip_gen: v6e
topology: v6e:2x2x1
jax: 0.10.0
libtpu: 0.0.40
codegen_flags: <defaults>
</compile_context>

<pallas_src>
import functools

import jax
import jax.numpy as jnp
from jax.experimental import pallas as pl
from jax.experimental.pallas import tpu as pltpu


def _linear_head_kernel(x_ref, w_ref, b_ref, logits_ref):
    # Cast in-kernel: supports bf16 (or f32) inputs without a wrapper-side
    # upcast that would double HBM traffic.
    x = x_ref[...].astype(jnp.float32)            # (TILE_B, D)
    w = w_ref[...].astype(jnp.float32)            # (1, D), resident
    b = b_ref[0]                                  # scalar bias from SMEM
    # Linear(input_dim, 1): per-row dot = VPU multiply + lane-axis reduce.
    # (Deliberately NOT jnp.dot/MXU: output width is 1.)
    logits = jnp.sum(x * w, axis=-1, keepdims=True) + b   # (TILE_B, 1) f32
    logits_ref[...] = logits.astype(logits_ref.dtype)


def _choose_tile_b(batch, dim, itemsize, target_bytes=2 * 1024 * 1024,
                   max_rows=2048):
    """Largest batch tile that keeps one x block ~target_bytes (mem-bound
    roofline is reached well before that) and is sublane-legal."""
    rows = target_bytes // max(1, dim * itemsize)
    rows = int(max(16, min(max_rows, rows)))
    align = 16 if itemsize < 4 else 8            # bf16 packs 2 rows/sublane
    rows = max(align, (rows // align) * align)
    if batch <= rows:
        return batch                              # full-dim block (always legal)
    return rows


def machamp_regression_forward(mlm_out, weight, bias, gold=None,
                               loss_weight=1.0, tile_b=None):
    """mlm_out: (B, D), weight: (1, D), bias: (1,), gold: (B,) or None.

    Returns (logits (B, 1) f32, loss scalar or None).
    """
    B, D = mlm_out.shape
    w2 = weight.reshape(1, D)
    b1 = bias.reshape(1).astype(jnp.float32)

    if tile_b is None:
        tile_b = _choose_tile_b(B, D, mlm_out.dtype.itemsize)
    tile_b = min(int(tile_b), B)
    if tile_b < B and tile_b % 8 != 0:
        tile_b = max(8, (tile_b // 8) * 8)        # keep sublane-legal blocks
    grid = (pl.cdiv(B, tile_b),)

    logits = pl.pallas_call(
        _linear_head_kernel,
        grid=grid,
        in_specs=[
            # x: tiled over batch, full hidden dim on the lane axis.
            pl.BlockSpec((tile_b, D), lambda i: (i, 0)),
            # weight row: constant block, stays resident in VMEM.
            pl.BlockSpec((1, D), lambda i: (0, 0)),
            # bias: single scalar in SMEM.
            pl.BlockSpec(memory_space=pltpu.MemorySpace.SMEM),
        ],
        out_specs=pl.BlockSpec((tile_b, 1), lambda i: (i, 0)),
        out_shape=jax.ShapeDtypeStruct((B, 1), jnp.float32),
        compiler_params=pltpu.CompilerParams(
            dimension_semantics=("parallel",),
        ),
    )(mlm_out, w2, b1)

    if gold is None:
        return logits, None

    # loss_weight * MSELoss(logits.flatten(), gold.flatten()); B floats only,
    # kept outside the kernel so the batch grid axis stays fully parallel.
    diff = logits.reshape(-1) - gold.reshape(-1).astype(jnp.float32)
    loss = jnp.float32(loss_weight) * jnp.mean(diff * diff)
    return logits, loss
    # TODO(synk): metric.score() bookkeeping from the PyTorch module is
    # host-side statistics and is intentionally not part of the kernel.


if __name__ == "__main__":
    key = jax.random.PRNGKey(0)
    k_x, k_w, k_b, k_g = jax.random.split(key, 4)

    # Small shapes; B deliberately NOT a multiple of tile_b to exercise the
    # gridded + ragged-last-tile path.
    B, D = 20, 32
    loss_weight = 1.0

    mlm_out = jax.random.normal(k_x, (B, D), dtype=jnp.float32)
    bound = 1.0 / (D ** 0.5)
    weight = jax.random.uniform(k_w, (1, D), minval=-bound, maxval=bound,
                                dtype=jnp.float32)
    bias = jax.random.uniform(k_b, (1,), minval=-bound, maxval=bound,
                              dtype=jnp.float32)
    gold = jax.random.normal(k_g, (B,), dtype=jnp.float32)

    fwd = functools.partial(machamp_regression_forward,
                            loss_weight=loss_weight, tile_b=8)
    logits, loss = fwd(mlm_out, weight, bias, gold)
    jax.block_until_ready((logits, loss))

    # Pure-JAX reference check.
    ref_logits = mlm_out @ weight.T + bias          # (B, 1)
    ref_loss = loss_weight * jnp.mean(
        (ref_logits.flatten() - gold.flatten()) ** 2)
    assert jnp.allclose(logits, ref_logits, atol=1e-5, rtol=1e-5)
    assert jnp.allclose(loss, ref_loss, atol=1e-5, rtol=1e-5)

    # gold=None path (logits only), mirroring the module's optional gold.
    logits_only, no_loss = machamp_regression_forward(mlm_out, weight, bias)
    jax.block_until_ready(logits_only)
    assert no_loss is None
    assert jnp.allclose(logits_only, ref_logits, atol=1e-5, rtol=1e-5)

    print("KERNEL_OK")
</pallas_src>

<mosaic_0001>
module attributes {stable_mosaic.version = 11 : i64} {
  func.func @_linear_head_kernel(%arg0: i32, %arg1: memref<8x32xf32, #tpu.memory_space<vmem>>, %arg2: memref<1x32xf32, #tpu.memory_space<vmem>>, %arg3: memref<1xf32, #tpu.memory_space<smem>>, %arg4: memref<8x1xf32, #tpu.memory_space<vmem>>) attributes {dimension_semantics = [#tpu.dimension_semantics<parallel>], iteration_bounds = array<i64: 3>, scalar_prefetch = 0 : i64, scratch_operands = 0 : i64, tpu.core_type = #tpu.core_type<tc>, window_params = [{transform_indices = @transform_0, window_bounds = array<i64: 8, 32>}, {pipeline_mode = #tpu.pipeline_mode<synchronous>, transform_indices = @transform_1, window_bounds = array<i64: 1, 32>}, {transform_indices = @transform_2, window_bounds = array<i64: 1>}, {transform_indices = @transform_3, window_bounds = array<i64: 8, 1>}]} {
    %c0 = arith.constant 0 : index
    %c0_0 = arith.constant 0 : index
    %0 = vector.load %arg1[%c0, %c0_0] : memref<8x32xf32, #tpu.memory_space<vmem>>, vector<8x32xf32>
    %c0_1 = arith.constant 0 : index
    %c0_2 = arith.constant 0 : index
    %1 = vector.load %arg2[%c0_1, %c0_2] : memref<1x32xf32, #tpu.memory_space<vmem>>, vector<1x32xf32>
    %c0_3 = arith.constant 0 : index
    %2 = memref.load %arg3[%c0_3] : memref<1xf32, #tpu.memory_space<smem>>
    %3 = vector.broadcast %1 : vector<1x32xf32> to vector<8x32xf32>
    %4 = arith.mulf %0, %3 : vector<8x32xf32>
    %cst = arith.constant dense<0.000000e+00> : vector<8xf32>
    %5 = vector.multi_reduction <add>, %4, %cst [1] : vector<8x32xf32> to vector<8xf32>
    %6 = vector.shape_cast %5 : vector<8xf32> to vector<8x1xf32>
    %7 = vector.broadcast %2 : f32 to vector<8x1xf32>
    %8 = arith.addf %6, %7 : vector<8x1xf32>
    %c0_4 = arith.constant 0 : index
    %c0_5 = arith.constant 0 : index
    %9 = vector.load %arg4[%c0_4, %c0_5] : memref<8x1xf32, #tpu.memory_space<vmem>>, vector<8x1xf32>
    tpu.vector_store %arg4[%c0_4, %c0_5], %8 {strides = array<i32>} : memref<8x1xf32, #tpu.memory_space<vmem>>, vector<8x1xf32>,
    return
  }
  func.func @transform_0(%arg0: i32) -> (i32, i32) {
    %c0_i32 = arith.constant 0 : i32
    %c0_i32_0 = arith.constant 0 : i32
    return %arg0, %c0_i32 : i32, i32
  }
  func.func @transform_1(%arg0: i32) -> (i32, i32) {
    %c0_i32 = arith.constant 0 : i32
    %c0_i32_0 = arith.constant 0 : i32
    %c0_i32_1 = arith.constant 0 : i32
    return %c0_i32, %c0_i32_0 : i32, i32
  }
  func.func @transform_2(%arg0: i32) -> i32 {
    %c0_i32 = arith.constant 0 : i32
    %c0_i32_0 = arith.constant 0 : i32
    return %c0_i32 : i32
  }
  func.func @transform_3(%arg0: i32) -> (i32, i32) {
    %c0_i32 = arith.constant 0 : i32
    %c0_i32_0 = arith.constant 0 : i32
    return %arg0, %c0_i32 : i32, i32
  }
}

</mosaic_0001>

<bundles_post_ra>
// kernel: tpu_custom_call.1
= control target key start
LH: loop header
LB: loop body
LE: loop exit
PB: predicated region body
PF: predicated region fallthrough
CT: control target
= control target key end

     0   :  { %s511_s0 = inlined_call_operand.hbm [shape: f32[20,32], index: 0, kind: input, shape index: {}]   ;;  %s512_s1 = inlined_call_operand.vmem [shape: f32[1,32], index: 1, kind: input, shape index: {}]   ;;  %s513_s2 = inlined_call_operand.<no memory space> [shape: f32[1], index: 2, kind: input, shape index: {}]   ;;  %s514_s3 = inlined_call_operand.vmem [shape: f32[20,1], index: 3, kind: output, shape index: {}]  }
   0x1   :  { %8 = sst [smem:[#allocation2]] %s513_s2 }
   0x2   :  { %9 = vsyncpa [#allocation4], 0 }
   0x3   :  { %11 = vsyncpa [#allocation4 + $0x1], 0  ;;  %s408_s14 = smov 0   ;;  %s410_s15 = smov 0  }
   0x4   :  { %s412_s16 = smov 0   ;;  %s414_s17 = smov 0  }
   0x5 LB: > { %s427_s2 = sadd.s32 4294967295, %s382_s17   ;;  %s430_s18 = sadd.s32 1, %s382_s17   ;;  %s382_s17 = sphi %s414_s17, %s524_s17   ;;  %s378_s16 = sphi %s412_s16, %s523_s16   ;;  %s374_s15 = sphi %s410_s15, %s522_s15   ;;  %s370_s14 = sphi %s408_s14, %s521_s14  }
   0x6   : > { %s21_s19 = ssub.s32 %s382_s17, %s430_s18  ;;  %s24_s20 = sadd.s32 1, %s378_s16 }
   0x7   : > { %p22_p0 = scmp.eq.s32.totalorder %s21_s19, 0  ;;  %p31_p1 = scmp.ne.s32.totalorder %s378_s16, %s374_s15 }
   0x8   : > { %p32_p2 = scmp.eq.s32.totalorder %s382_s17, 0  ;;  %p37_p3 = scmp.ne.s32.totalorder %s374_s15, %s370_s14 }
   0x9   : > { %s440_s21 = scalar_select %p22_p0, %s378_s16, %s24_s20  }
   0xa   : > { %p33_p4 = por %p32_p2, %p31_p1  ;;  %p38_p5 = scmp.eq.s32.totalorder %s427_s2, 0 }
   0xb   : > { %p287_p6 = scmp.lt.s32.totalorder %s382_s17, 3  ;;  %s135_s23 = sand.u32 1, %s378_s16  }
   0xc   : > { %p444_p7 = por %p38_p5, %p37_p3  ;;  %s273_s24 = sshll.u32 %s135_s23, 3 }
   0xd   : > { %s274_s25 = sshll.u32 %s382_s17, 7  ;;  %s139_s29 = scalar_lea.vmem [#allocation3], %s273_s24 }
   0xe   : > { %s516_s22 = scalar_select %p444_p7, 1, 0 }
   0xf   : > { %s453_s28 = scalar_lea.hbm %s511_s0, %s274_s25  ;;  %s146_s30 = sshll.u32 %s139_s29, 4  ;;  %s455_s30 = int_to_ptr.vmem [resolvable:$true] %s146_s30 }
  0x10   : > { %p457_p8 = pnand %p287_p6, %p33_p4  ;;  %s136_s5 = scalar_lea.sflag [#allocation4], %s135_s23 }
  0x11   : > { %s320_s6 = scalar_lea.hbm %s453_s28, 128  ;;  %s325_s9 = scalar_lea.hbm %s511_s0, 384 }
  0x12   : > { %p321_p11 = scmp.ne.s32.totalorder %s453_s28, %s320_s6  ;;  %p322_p12 = pneg %p457_p8 }
  0x13   : > { %p326_p1 = scmp.lt.s32.totalorder %s453_s28, %s511_s0  ;;  %p327_p2 = scmp.lt.s32.totalorder %s325_s9, %s320_s6 }
  0x14   : > { %p323_p13 = pnand %p322_p12, %p321_p11 }
  0x15   : > { %p328_p3 = por %p327_p2, %p326_p1 }
  0x16   : > { %p324_p0 = pneg %p323_p13 }
  0x18   : > { %p329_p4 = pnand %p328_p3, %p324_p0 }
  0x1a   : > { %332 = shalt.err (!%p329_p4)
}
  0x1b   : > { %s333_s12 = scalar_lea.vmem %s455_s30, 128  ;;  %s384_s13 = smov [#allocation3]  }
  0x1c   : > { %p334_p5 = scmp.ne.s32.totalorder %s455_s30, %s333_s12  ;;  %s338_s14 = sshll.u32 %s384_s13, 4  ;;  %s339_s14 = int_to_ptr.vmem [resolvable:$false] %s338_s14 }
  0x1d   : > { %s340_s19 = scalar_lea.vmem %s339_s14, 256  ;;  %p341_p13 = scmp.lt.s32.totalorder %s455_s30, %s339_s14 }
  0x1e   : > { %p336_p6 = pnand %p334_p5, %p322_p12  ;;  %p342_p9 = scmp.lt.s32.totalorder %s340_s19, %s333_s12 }
  0x20   : > { %p337_p11 = pneg %p336_p6  ;;  %p343_p10 = por %p342_p9, %p341_p13 }
  0x22   : > { %p344_p7 = pnand %p343_p10, %p337_p11 }
  0x24   : > { %347 = shalt.err (!%p344_p7)
}
  0x25   : > { %286 = dma.hbm_to_vmem [thread:$0]  (!%p457_p8), %s453_s28, 128, %s455_s30, %s136_s5  }
  0x26   : > { %p518_p0 = scmp.lt.s32.totalorder %s382_s17, 4  ;;  %p519_p1 = scmp.ge.s32.totalorder %s382_s17, 1 }
  0x28   : > { %p152_p12 = pnand %p519_p1, %p518_p0 }
  0x29   : > { %s157_s20 = sand.u32 (!%p152_p12), 1, %s374_s15   ;;  %p520_p9 = scmp.ne.s32.totalorder (!%p152_p12), %s516_s22, 0 }
  0x2a   : > { %155 = sbr.rel (%p152_p12) target bundleno = 194 (0xc2), region = 32  ;;  %s276_s23 = sshll.u32 (!%p152_p12), %s157_s20, 3 }
  0x2b   : > { %s158_s24 = scalar_lea.sflag (!%p152_p12), [#allocation4], %s157_s20  ;;  %s161_s25 = scalar_lea.vmem (!%p152_p12), [#allocation3], %s276_s23 }
  0x2f   : > { %365 = dma.done.wait (%p520_p9), %s158_s24, 128  }
  0x30   : > { %367 = vsyncadd (%p520_p9), %s158_s24, 4294967168  ;;  %v187_v0 = vld [vmem:[%s161_s25] sm:$0xff]  ;;  %vm197_vm0 = vcmask 261120   ;;  %p183_p7 = scmp.lt.s32.totalorder %s427_s2, 2  ;;  %s189_s17 = sld [smem:[#allocation2]]  ;;  %vm203_vm1 = vcmask 7168  }
  0x31   : > { %v278_v1 = vld [vmem:[%s512_s1] ss:$0 sm:$0xff] }
  0x32   : > { %v196_v2 = vmul.f32 %v278_v1, %v187_v0  ;;  %s526_s2 = smov (!%p183_p7, %s427_s2), 2 }
  0x33   : > { %s277_s28 = sshll.u32 %s526_s2, 3 }
  0x34   : > { %v198_v3 = vsel %vm197_vm0, %v196_v2, 0.0  ;;  %s186_s22 = scalar_lea.vmem %s514_s3, %s277_s28 }
  0x35   : > { %199 = vadd.xlane.f32.xlu0 %v198_v3 }
  0x36   : > { %v201_v4 = vstv %s189_s17 }
  0xbe   : > { %v200_v5 = vpop.xlane.xlu0 %199 }
  0xbf   : > { %v202_v6 = vadd.f32 %v201_v4, %v200_v5 }
  0xc1   : > { %204 = vst.msk [vmem:[%s186_s22] sm:$0xff] %vm203_vm1, %v202_v6 }
  0xc2 PF: > { %p14_p8 = scmp.ge.s32.totalorder %s430_s18, 5   ;;  %s521_s14 = smov %s374_s15 }
  0xc3   : > { %s522_s15 = smov %s378_s16  ;;  %s523_s16 = smov %s440_s21 }
  0xc4   : > { %s524_s17 = smov %s430_s18  ;;  %16 = sbr.rel (!%p14_p8) target bundleno = 5 (0x5), region = 72 }
  0xc9   :  { %224 = vsyncpa [#allocation4], 1 }
  0xca   :  { %226 = vsyncpa [#allocation4 + $0x1], 1 }

</bundles_post_ra>
